<compile_context>
chip_gen: v7x
topology: tpu7x:2x2x1
jax: 0.10.0
libtpu: 0.0.40
codegen_flags: <defaults>
</compile_context>

<pallas_src>
import jax
import jax.numpy as jnp
from jax.experimental import pallas as pl
from jax.experimental.pallas import tpu as pltpu

# Lanes per grid step.  VMEM per step (f32, double-buffered):
#   (9*C_in + C_out) * 4B * 2 * 8192  ~= 5 MB  for C_in=3, C_out=48  -> safe
# well inside the default scoped-VMEM limit on v5e/v6e/v7x.
_MAX_HW_TILE = 8192


def _pick_hw_tile(hw: int) -> int:
    """Largest lane-dense spatial tile: full HW if small, else a big multiple of 128."""
    if hw <= _MAX_HW_TILE:
        return hw
    # Prefer an exact divisor that is a multiple of 128 (no ragged tail).
    t = (_MAX_HW_TILE // 128) * 128
    while t >= 128:
        if hw % t == 0:
            return t
        t -= 128
    # No friendly divisor: fixed lane-dense tile, ragged tail masked by Pallas.
    return (_MAX_HW_TILE // 128) * 128


def _conv3x3_bias_kernel(w_ref, b_ref, p_ref, o_ref):
    # w_ref: (C_out, 9*C_in)    b_ref: (C_out, 1)
    # p_ref: (9*C_in, HW_tile)  o_ref: (C_out, HW_tile)   -- lane-dense output
    acc = jnp.dot(w_ref[...], p_ref[...], preferred_element_type=jnp.float32)
    o_ref[...] = (acc + b_ref[...]).astype(o_ref.dtype)


def _conv3x3_kernel(w_ref, p_ref, o_ref):
    # Bias-free variant: skips the broadcast add and the extra operand DMA.
    acc = jnp.dot(w_ref[...], p_ref[...], preferred_element_type=jnp.float32)
    o_ref[...] = acc.astype(o_ref.dtype)


def _im2col_3x3_s1_p1(x):
    """x: (N, C, H, W) -> (N, 9*C, H*W); tap index = (kh*3 + kw)*C + ci."""
    n, c, h, w = x.shape
    xp = jnp.pad(x, ((0, 0), (0, 0), (1, 1), (1, 1)))
    taps = [xp[:, :, kh:kh + h, kw:kw + w] for kh in range(3) for kw in range(3)]
    return jnp.stack(taps, axis=1).reshape(n, 9 * c, h * w)


@jax.jit
def _overlap_patch_embed_fwd(x, w_flat, b_col):
    n, c_in, h, wdt = x.shape
    c_out, k = w_flat.shape          # k = 9 * c_in
    hw = h * wdt

    patches = _im2col_3x3_s1_p1(x)   # (N, 9*C_in, HW) — single plain-JAX pass
    hw_tile = _pick_hw_tile(hw)
    grid = (n, pl.cdiv(hw, hw_tile))

    # Advisory cost hint for XLA's scheduler around the custom call.
    cost = pl.CostEstimate(
        flops=2 * n * c_out * k * hw,
        transcendentals=0,
        bytes_accessed=4 * (n * k * hw + n * c_out * hw + c_out * k + c_out),
    )

    if b_col is None:
        kernel = _conv3x3_kernel
        operands = (w_flat, patches)
        in_specs = [
            # grid-invariant weight (tiny; resident tile, constant index_map)
            pl.BlockSpec((c_out, k), lambda i, t: (0, 0)),
            # per-sample / per-spatial-tile patches (batch dim squeezed)
            pl.BlockSpec((None, k, hw_tile), lambda i, t: (i, 0, t)),
        ]
    else:
        kernel = _conv3x3_bias_kernel
        operands = (w_flat, b_col, patches)
        in_specs = [
            pl.BlockSpec((c_out, k), lambda i, t: (0, 0)),   # weight
            pl.BlockSpec((c_out, 1), lambda i, t: (0, 0)),   # bias column
            pl.BlockSpec((None, k, hw_tile), lambda i, t: (i, 0, t)),
        ]

    out2d = pl.pallas_call(
        kernel,
        out_shape=jax.ShapeDtypeStruct((n, c_out, hw), x.dtype),
        grid_spec=pltpu.PrefetchScalarGridSpec(
            num_scalar_prefetch=0,
            grid=grid,
            in_specs=in_specs,
            out_specs=pl.BlockSpec((None, c_out, hw_tile), lambda i, t: (i, 0, t)),
        ),
        compiler_params=pltpu.CompilerParams(
            dimension_semantics=("parallel", "parallel")),
        cost_estimate=cost,
    )(*operands)

    # (N, C_out, H*W) -> (N, C_out, H, W): contiguous reshape, no transpose.
    return out2d.reshape(n, c_out, h, wdt)


class OverlapPatchEmbed:
    """Pallas TPU port of the PyTorch OverlapPatchEmbed (3x3 conv, stride 1, pad 1)."""

    def __init__(self, in_c=3, embed_dim=48, bias=False, *, key):
        k_w, k_b = jax.random.split(key)
        fan_in = in_c * 3 * 3
        bound = 1.0 / (fan_in ** 0.5)  # PyTorch Conv2d default init range
        # OIHW weight, same layout/orientation as torch: out = sum w[co,ci,kh,kw]*x
        self.weight = jax.random.uniform(
            k_w, (embed_dim, in_c, 3, 3), jnp.float32, -bound, bound)
        # Flatten to (C_out, 9*C_in) matching im2col tap order (kh*3 + kw)*C_in + ci.
        self.w_flat = jnp.transpose(self.weight, (0, 2, 3, 1)).reshape(embed_dim, 9 * in_c)
        if bias:
            self.bias = jax.random.uniform(k_b, (embed_dim,), jnp.float32, -bound, bound)
            self.b_col = self.bias.reshape(embed_dim, 1)
        else:
            self.bias = None
            self.b_col = None

    def __call__(self, x):
        return _overlap_patch_embed_fwd(x, self.w_flat, self.b_col)


if __name__ == "__main__":
    key = jax.random.PRNGKey(0)
    k_x, k_m = jax.random.split(key)

    N, C_IN, H, W = 2, 3, 16, 16
    EMBED_DIM = 48

    x = jax.random.normal(k_x, (N, C_IN, H, W), jnp.float32)
    patch_embed = OverlapPatchEmbed(in_c=C_IN, embed_dim=EMBED_DIM, bias=False, key=k_m)

    out = jax.block_until_ready(patch_embed(x))
    assert out.shape == (N, EMBED_DIM, H, W)

    # Sanity check against XLA's conv (same cross-correlation semantics).
    ref = jax.lax.conv_general_dilated(
        x, patch_embed.weight, window_strides=(1, 1), padding=((1, 1), (1, 1)),
        dimension_numbers=("NCHW", "OIHW", "NCHW"))
    ref = jax.block_until_ready(ref)
    max_err = float(jnp.max(jnp.abs(out - ref)))
    max_ref = float(jnp.max(jnp.abs(ref)))
    assert max_err <= 5e-2 + 5e-2 * max_ref, f"mismatch vs reference conv: {max_err}"

    print("KERNEL_OK")
</pallas_src>

<mosaic_0001>
module attributes {stable_mosaic.version = 11 : i64} {
  func.func @_conv3x3_kernel(%arg0: i32, %arg1: i32, %arg2: memref<48x27xf32, #tpu.memory_space<vmem>>, %arg3: memref<1x27x256xf32, #tpu.memory_space<vmem>>, %arg4: memref<1x48x256xf32, #tpu.memory_space<vmem>>) attributes {dimension_semantics = [#tpu.dimension_semantics<parallel>, #tpu.dimension_semantics<parallel>], iteration_bounds = array<i64: 2, 1>, scalar_prefetch = 0 : i64, scratch_operands = 0 : i64, tpu.core_type = #tpu.core_type<tc>, window_params = [{pipeline_mode = #tpu.pipeline_mode<synchronous>, transform_indices = @transform_0, window_bounds = array<i64: 48, 27>}, {transform_indices = @transform_1, window_bounds = array<i64: 1, 27, 256>}, {transform_indices = @transform_2, window_bounds = array<i64: 1, 48, 256>}]} {
    %c0 = arith.constant 0 : index
    %c0_0 = arith.constant 0 : index
    %0 = vector.load %arg2[%c0, %c0_0] : memref<48x27xf32, #tpu.memory_space<vmem>>, vector<48x27xf32>
    %c0_1 = arith.constant 0 : index
    %c0_2 = arith.constant 0 : index
    %c0_3 = arith.constant 0 : index
    %1 = vector.load %arg3[%c0_1, %c0_2, %c0_3] : memref<1x27x256xf32, #tpu.memory_space<vmem>>, vector<1x27x256xf32>
    %2 = vector.shape_cast %1 : vector<1x27x256xf32> to vector<27x256xf32>
    %cst = arith.constant dense<0.000000e+00> : vector<48x256xf32>
    %3 = tpu.matmul %0, %2, %cst {dimension_numbers = #tpu.dot_dimension_numbers<[1], [0], [0], [1], [0, 0, 1, 1], [], []>} : vector<48x27xf32>, vector<27x256xf32>, vector<48x256xf32> -> vector<48x256xf32>
    %c0_4 = arith.constant 0 : index
    %c0_5 = arith.constant 0 : index
    %c0_6 = arith.constant 0 : index
    %4 = vector.load %arg4[%c0_4, %c0_5, %c0_6] : memref<1x48x256xf32, #tpu.memory_space<vmem>>, vector<1x48x256xf32>
    %5 = vector.shape_cast %4 : vector<1x48x256xf32> to vector<48x256xf32>
    %6 = vector.shape_cast %3 : vector<48x256xf32> to vector<1x48x256xf32>
    tpu.vector_store %arg4[%c0_4, %c0_5, %c0_6], %6 {strides = array<i32>} : memref<1x48x256xf32, #tpu.memory_space<vmem>>, vector<1x48x256xf32>,
    return
  }
  func.func @transform_0(%arg0: i32, %arg1: i32) -> (i32, i32) {
    %c0_i32 = arith.constant 0 : i32
    %c0_i32_0 = arith.constant 0 : i32
    %c0_i32_1 = arith.constant 0 : i32
    return %c0_i32, %c0_i32_0 : i32, i32
  }
  func.func @transform_1(%arg0: i32, %arg1: i32) -> (i32, i32, i32) {
    %c0_i32 = arith.constant 0 : i32
    %c0_i32_0 = arith.constant 0 : i32
    return %arg0, %c0_i32, %arg1 : i32, i32, i32
  }
  func.func @transform_2(%arg0: i32, %arg1: i32) -> (i32, i32, i32) {
    %c0_i32 = arith.constant 0 : i32
    %c0_i32_0 = arith.constant 0 : i32
    return %arg0, %c0_i32, %arg1 : i32, i32, i32
  }
}

</mosaic_0001>

<bundles_post_ra>
// kernel: _overlap_patch_embed_fwd.1
= control target key start
LH: loop header
LB: loop body
LE: loop exit
PB: predicated region body
PF: predicated region fallthrough
CT: control target
= control target key end

     0   :  { %s524_s9 = smov 0   ;;  %s526_s10 = smov 0   ;;  %s579_s0 = inlined_call_operand.vmem [shape: f32[48,27], index: 0, kind: input, shape index: {}]   ;;  %s580_s1 = inlined_call_operand.vmem [shape: f32[2,27,256], index: 1, kind: input, shape index: {}]   ;;  %s581_s2 = inlined_call_operand.vmem [shape: f32[2,48,256], index: 2, kind: output, shape index: {}]  }
   0x1   :  { %s528_s11 = smov 0  }
   0x2 LB: > { %s24_s12 = sadd.s32 1, %s501_s10  ;;  %p427_p0 = scmp.ge.s32.totalorder %s505_s11, 1  ;;  %s505_s11 = sphi %s528_s11, %s12_s11   ;;  %s501_s10 = sphi %s526_s10, %s583_s10   ;;  %s497_s9 = sphi %s524_s9, %s582_s9  }
   0x3   : > { %p26_p1 = scmp.ge.s32.totalorder %s24_s12, 2  ;;  %p133_p2 = scmp.lt.s32.totalorder %s505_s11, 3 }
   0x5   : > { %s585_s12 = smov (%p26_p1, %s24_s12), 0  ;;  %p134_p3 = pnand %p427_p0, %p133_p2 }
   0x6   : > { %p164_p4 = scmp.lt.s32.totalorder (!%p134_p3), %s497_s9, 1  ;;  %v507_v0 = vmov (!%p134_p3), 0.0   ;;  %vm216_vm0 = vcmask (!%p134_p3), 1042432   ;;  %vm508_vm1 = vmmov (!%p134_p3), 1   ;;  %v183_v13 = vld [vmem:[%s579_s0] sm:$0xff] (!%p134_p3)  ;;  %vm197_vm3 = vcmask (!%p134_p3), 220160  }
   0x7   : > { %137 = sbr.rel (%p134_p3) target bundleno = 250 (0xfa), region = 28  ;;  %287 = vmatprep.mubr.f32.mxu0 (!%p134_p3), %v507_v0  ;;  %305 = vmatprep.mubr.f32.mxu1 (!%p134_p3), %v507_v0  ;;  %vm447_vm2 = vmpackc.low (!%p134_p3), %vm216_vm0, %vm508_vm1  ;;  %v186_v14 = vld [vmem:[%s579_s0 + $0x18] sm:$0xff] (!%p134_p3)  ;;  %v184_v15 = vld [vmem:[%s579_s0 + $0x8] sm:$0xff] (!%p134_p3) }
   0x8   : > { %v187_v16 = vld [vmem:[%s579_s0 + $0x20] sm:$0xff] (!%p134_p3)  ;;  %v185_v17 = vld [vmem:[%s579_s0 + $0x10] sm:$0xff] (!%p134_p3)  ;;  %v188_v18 = vld [vmem:[%s579_s0 + $0x28] sm:$0xff] (!%p134_p3) }
   0xe   : > { %s587_s9 = smov (!%p164_p4, %s497_s9), 1 }
   0xf   : > { %s441_s13 = sshll.u32 %s587_s9, 6  ;;  %s456_s29 = smul.u32 96, %s587_s9 }
  0x10   : > { %s171_s16 = scalar_lea.vmem %s580_s1, %s441_s13 }
  0x11   : > { %v190_v1 = vld [vmem:[%s171_s16 + $0x8] sm:$0xff]  ;;  %v192_v2 = vld [vmem:[%s171_s16 + $0x18] sm:$0xff]  ;;  %v189_v3 = vld [vmem:[%s171_s16] sm:$0xff]  ;;  %s181_s4 = scalar_lea.vmem %s581_s2, %s456_s29 }
  0x12   : > { %v442_v4 = vpack.c.bf16 %v192_v2, %v190_v1  ;;  %v191_v5 = vld [vmem:[%s171_s16 + $0x10] sm:$0xff]  ;;  %v194_v6 = vld [vmem:[%s171_s16 + $0x28] sm:$0xff]  ;;  %v196_v7 = vld [vmem:[%s171_s16 + $0x38] sm:$0x7] }
  0x13   : > { %v444_v8 = vpack.c.bf16 %v191_v5, %v189_v3  ;;  %v446_v9 = vpack.c.bf16 %v196_v7, %v194_v6  ;;  %v193_v10 = vld [vmem:[%s171_s16 + $0x20] sm:$0xff]  ;;  %v195_v11 = vld [vmem:[%s171_s16 + $0x30] sm:$0x7] }
  0x14   : > { %443 = vmatprep.subr.bf16.mxu0 %v442_v4  ;;  %452 = vmatprep.subr.bf16.mxu1 %v442_v4  ;;  %v449_v12 = vpack.c.bf16 %v195_v11, %v193_v10 }
  0x15   : > { %445 = vmatpush1.bf16.msra.mxu0 %v444_v8  ;;  %454 = vmatpush1.bf16.msra.mxu1 %v444_v8 }
  0x16   : > { %448 = vmatprep.subr.msk.bf16.mxu0 %vm447_vm2, %v446_v9  ;;  %453 = vmatprep.subr.msk.bf16.mxu1 %vm447_vm2, %v446_v9 }
  0x19   : > { %451 = vmatpush1.bf16.msk.msra.mxu0 %vm447_vm2, %v449_v12  ;;  %455 = vmatpush1.bf16.msk.msra.mxu1 %vm447_vm2, %v449_v12 }
  0x1c   : > { %433 = vmatmul.mubr.msk.f32.vlgmr.msra.gmra.mrb[0].mxu0 %vm197_vm3, %v183_v13  ;;  %436 = vmatmul.mubr.msk.f32.vlgmr.msra.gmra.mrb[0].mxu1 %vm197_vm3, %v186_v14 }
  0x1d   : > { %293 = vmatprep.mubr.f32.mxu0 %v507_v0  ;;  %311 = vmatprep.mubr.f32.mxu1 %v507_v0 }
  0x20   : > { %434 = vmatmul.mubr.msk.f32.gmra.mrb[2].mxu0 %vm197_vm3, %v184_v15  ;;  %437 = vmatmul.mubr.msk.f32.gmra.mrb[2].mxu1 %vm197_vm3, %v187_v16 }
  0x21   : > { %299 = vmatprep.mubr.f32.mxu0 %v507_v0  ;;  %317 = vmatprep.mubr.f32.mxu1 %v507_v0 }
  0x24   : > { %435 = vmatmul.mubr.msk.f32.gmra.mrb[4].mxu0 %vm197_vm3, %v185_v17  ;;  %438 = vmatmul.mubr.msk.f32.gmra.mrb[4].mxu1 %vm197_vm3, %v188_v18 }
  0xef   : > { %v289_v19 = vpop.f32.mrb[0].mxu0  ;;  %v307_v20 = vpop.f32.mrb[0].mxu1 }
  0xf0   : > { %324 = vst [vmem:[%s181_s4] sm:$0xff] %v289_v19  ;;  %330 = vst [vmem:[%s181_s4 + $0x30] sm:$0xff] %v307_v20  ;;  %v291_v21 = vpop.f32.mrb[1].mxu0  ;;  %v309_v22 = vpop.f32.mrb[1].mxu1 }
  0xf1   : > { %325 = vst [vmem:[%s181_s4 + $0x8] sm:$0xff] %v291_v21  ;;  %331 = vst [vmem:[%s181_s4 + $0x38] sm:$0xff] %v309_v22 }
  0xf3   : > { %v295_v23 = vpop.f32.mrb[2].mxu0  ;;  %v313_v24 = vpop.f32.mrb[2].mxu1 }
  0xf4   : > { %326 = vst [vmem:[%s181_s4 + $0x10] sm:$0xff] %v295_v23  ;;  %332 = vst [vmem:[%s181_s4 + $0x40] sm:$0xff] %v313_v24  ;;  %v297_v25 = vpop.f32.mrb[3].mxu0  ;;  %v315_v26 = vpop.f32.mrb[3].mxu1 }
  0xf5   : > { %327 = vst [vmem:[%s181_s4 + $0x18] sm:$0xff] %v297_v25  ;;  %333 = vst [vmem:[%s181_s4 + $0x48] sm:$0xff] %v315_v26 }
  0xf7   : > { %v301_v27 = vpop.f32.mrb[4].mxu0  ;;  %v319_v28 = vpop.f32.mrb[4].mxu1 }
  0xf8   : > { %328 = vst [vmem:[%s181_s4 + $0x20] sm:$0xff] %v301_v27  ;;  %334 = vst [vmem:[%s181_s4 + $0x50] sm:$0xff] %v319_v28  ;;  %v303_v29 = vpop.f32.mrb[5].mxu0  ;;  %v321_v30 = vpop.f32.mrb[5].mxu1 }
  0xf9   : > { %329 = vst [vmem:[%s181_s4 + $0x28] sm:$0xff] %v303_v29  ;;  %335 = vst [vmem:[%s181_s4 + $0x58] sm:$0xff] %v321_v30 }
  0xfa PF: > { %s12_s11 = sadd.s32 1, %s505_s11   ;;  %s582_s9 = smov %s501_s10 }
  0xfb   : > { %p9_p5 = scmp.ge.s32.totalorder %s12_s11, 4   ;;  %s583_s10 = smov %s585_s12 }
  0xfd   :  { %11 = sbr.rel (!%p9_p5) target bundleno = 2 (0x2), region = 58 }

</bundles_post_ra>
